<compile_context>
chip_gen: v6e
topology: v6e:2x2x1
jax: 0.10.0
libtpu: 0.0.40
codegen_flags: <defaults>
</compile_context>

<pallas_src>
import functools
import math

import jax
import jax.numpy as jnp
from jax import lax
from jax.experimental import pallas as pl
from jax.experimental.pallas import tpu as pltpu

LANE = 128


def _round_up(x, m):
    return ((x + m - 1) // m) * m


def _vmem_spec():
    # whole-array block resident in VMEM (no grid -> no (8,128) block constraint).
    return pl.BlockSpec(memory_space=pltpu.MemorySpace.VMEM)


# ---------------------------------------------------------------------------
# Fused forward kernel
#   x_ref   [N, P]        padded node features
#   adj_ref [N, N]        adj[i, j] = 1 iff edge j -> i
#   wl_ref  [L, P, 4P]    per-layer Wq*scale | Wk | Wv | Wskip, each block 128-lane aligned
#   bl_ref  [L, 1, 4P]
#   wt_ref  [2, P, OP]    [0] = gcn_shared W (padded), [1] = gcn_mu||gcn_logvar W (padded)
#   bt_ref  [2, 1, OP]
#   o_ref   [N, OP]       mu || logvar || zero-pad (lane-dense store)
# ---------------------------------------------------------------------------
def _fused_encoder_kernel(x_ref, adj_ref, wl_ref, bl_ref, wt_ref, bt_ref, o_ref,
                          *, num_layers, hp):
    adj = adj_ref[...]                                   # [N, N]
    n = adj.shape[0]
    mask = adj > 0.0

    # GCN self-loop adjacency + symmetric normalization scales, computed in-kernel.
    rows = lax.broadcasted_iota(jnp.int32, (n, n), 0)
    cols = lax.broadcasted_iota(jnp.int32, (n, n), 1)
    adj_sl = adj + (rows == cols).astype(adj.dtype)      # A + I
    deg = jnp.sum(adj_sl, axis=-1, keepdims=True)        # [N, 1]
    dinv = jnp.where(deg > 0.0, lax.rsqrt(deg), 0.0)     # D^-1/2

    h = x_ref[...]                                       # [N, P]
    for l in range(num_layers):
        w_all = wl_ref[l]                                # [P, 4P]
        b_all = bl_ref[l]                                # [1, 4P]
        qkvs = jnp.dot(h, w_all, preferred_element_type=jnp.float32) + b_all
        # 128-lane-aligned slices (padded lanes are exact zeros).
        q = qkvs[:, 0 * hp:1 * hp]
        k = qkvs[:, 1 * hp:2 * hp]
        v = qkvs[:, 2 * hp:3 * hp]
        skip = qkvs[:, 3 * hp:4 * hp]

        # scores[i, j] = q_i . k_j  (1/sqrt(H) pre-folded into Wq/bq at pack time)
        scores = lax.dot_general(q, k, (((1,), (1,)), ((), ())),
                                 preferred_element_type=jnp.float32)
        masked = jnp.where(mask, scores, jnp.float32(-1e30))
        m = jnp.max(masked, axis=-1, keepdims=True)
        p = jnp.where(mask, jnp.exp(masked - m), 0.0)
        denom = jnp.sum(p, axis=-1, keepdims=True)
        inv = pl.reciprocal(jnp.where(denom > 0.0, denom, 1.0), approx=True)  # [N,1]
        # normalize after the matmul: scales [N, P] instead of dividing the [N, N] attn matrix
        agg = jnp.dot(p, v, preferred_element_type=jnp.float32) * inv
        h = agg + skip
        # TODO(synk): feat_drop / attention dropout are training-only ops; eval mode = identity.

    # a_norm @ M == dinv * (adj_sl @ (dinv * M))  -- never materialize a_norm.
    def gcn_prop(m_):
        return dinv * jnp.dot(adj_sl, dinv * m_, preferred_element_type=jnp.float32)

    # gcn_shared + ReLU
    hs = gcn_prop(jnp.dot(h, wt_ref[0], preferred_element_type=jnp.float32)) + bt_ref[0]
    hs = jnp.maximum(hs, 0.0)
    # fused mu||logvar head, single lane-dense [N, OP] store
    out = gcn_prop(jnp.dot(hs, wt_ref[1], preferred_element_type=jnp.float32)) + bt_ref[1]
    o_ref[...] = out.astype(o_ref.dtype)


# ---------------------------------------------------------------------------
# One-time parameter packing (NOT in the forward hot path)
# ---------------------------------------------------------------------------
def pack_params(params, num_layers):
    """Fold the attention scale, concatenate and lane-pad all weights into 4 slabs."""
    input_dim = params["encoder"][0]["wq"].shape[0]
    hidden_dim = params["encoder"][0]["wq"].shape[1]
    out_dim = params["gcn_mu"]["w"].shape[1]

    p_dim = _round_up(max(input_dim, hidden_dim), LANE)            # padded feature width
    op_dim = _round_up(max(params["gcn_shared"]["w"].shape[1], 2 * out_dim), LANE)

    w_layers, b_layers = [], []
    for l in range(num_layers):
        p = params["encoder"][l]
        din, hdim = p["wq"].shape
        scale = jnp.float32(1.0 / math.sqrt(float(hdim)))
        w = jnp.zeros((p_dim, 4 * p_dim), jnp.float32)
        b = jnp.zeros((1, 4 * p_dim), jnp.float32)
        blocks = ((p["wq"] * scale, p["bq"] * scale),
                  (p["wk"], p["bk"]), (p["wv"], p["bv"]), (p["ws"], p["bs"]))
        for i, (wi, bi) in enumerate(blocks):
            w = w.at[:din, i * p_dim:i * p_dim + hdim].set(wi)
            b = b.at[:, i * p_dim:i * p_dim + hdim].set(bi)
        w_layers.append(w)
        b_layers.append(b)

    sh_w, sh_b = params["gcn_shared"]["w"], params["gcn_shared"]["b"]
    mu_w, mu_b = params["gcn_mu"]["w"], params["gcn_mu"]["b"]
    lv_w, lv_b = params["gcn_logvar"]["w"], params["gcn_logvar"]["b"]

    w_sh = jnp.zeros((p_dim, op_dim), jnp.float32).at[:sh_w.shape[0], :sh_w.shape[1]].set(sh_w)
    b_sh = jnp.zeros((1, op_dim), jnp.float32).at[:, :sh_b.shape[1]].set(sh_b)
    w_hd = (jnp.zeros((p_dim, op_dim), jnp.float32)
            .at[:mu_w.shape[0], :out_dim].set(mu_w)
            .at[:lv_w.shape[0], out_dim:2 * out_dim].set(lv_w))
    b_hd = (jnp.zeros((1, op_dim), jnp.float32)
            .at[:, :out_dim].set(mu_b)
            .at[:, out_dim:2 * out_dim].set(lv_b))

    packed = dict(
        w_layers=jnp.stack(w_layers),        # [L, P, 4P]
        b_layers=jnp.stack(b_layers),        # [L, 1, 4P]
        w_tail=jnp.stack([w_sh, w_hd]),      # [2, P, OP]
        b_tail=jnp.stack([b_sh, b_hd]),      # [2, 1, OP]
    )
    return jax.device_put(packed), out_dim


# ---------------------------------------------------------------------------
# Forward wrapper (hot path: one pad + one pallas_call + two output slices)
# ---------------------------------------------------------------------------
@functools.partial(jax.jit, static_argnames=("out_dim",))
def transformer_conv_encoder(packed, x, adj, *, out_dim):
    """x: [N, Din] node features; adj: [N, N] with adj[i, j] = 1 iff edge j -> i."""
    n, din = x.shape
    wl, bl = packed["w_layers"], packed["b_layers"]
    wt, bt = packed["w_tail"], packed["b_tail"]
    num_layers = wl.shape[0]
    p_dim = wl.shape[1]
    hp = wl.shape[2] // 4
    op_dim = wt.shape[2]

    x_pad = jnp.pad(x, ((0, 0), (0, p_dim - din)))

    out = pl.pallas_call(
        functools.partial(_fused_encoder_kernel, num_layers=num_layers, hp=hp),
        in_specs=[_vmem_spec()] * 6,
        out_specs=_vmem_spec(),
        out_shape=jax.ShapeDtypeStruct((n, op_dim), jnp.float32),
    )(x_pad, adj, wl, bl, wt, bt)

    return out[:, :out_dim], out[:, out_dim:2 * out_dim]


# ---------------------------------------------------------------------------
# Parameter init (deterministic, synthetic)
# ---------------------------------------------------------------------------
def _linear(key, fan_in, fan_out):
    k1, k2 = jax.random.split(key)
    w = jax.random.normal(k1, (fan_in, fan_out), jnp.float32) / math.sqrt(fan_in)
    b = 0.01 * jax.random.normal(k2, (1, fan_out), jnp.float32)
    return w, b


def init_params(key, input_dim, hidden_dim, num_layers):
    params = {"encoder": []}
    keys = jax.random.split(key, num_layers + 3)
    for l in range(num_layers):
        din = input_dim if l == 0 else hidden_dim
        ks = jax.random.split(keys[l], 4)
        wq, bq = _linear(ks[0], din, hidden_dim)
        wk, bk = _linear(ks[1], din, hidden_dim)
        wv, bv = _linear(ks[2], din, hidden_dim)
        ws, bs = _linear(ks[3], din, hidden_dim)
        params["encoder"].append(dict(wq=wq, bq=bq, wk=wk, bk=bk,
                                      wv=wv, bv=bv, ws=ws, bs=bs))
    for idx, name in enumerate(("gcn_shared", "gcn_mu", "gcn_logvar")):
        w, b = _linear(keys[num_layers + idx], hidden_dim, input_dim)
        params[name] = dict(w=w, b=b)
    return params


if __name__ == "__main__":
    N = 16            # number of graph nodes
    INPUT_DIM = 32    # module's input_dim
    HIDDEN_DIM = 32   # module's hidden_dim
    NUM_LAYERS = 2

    key = jax.random.PRNGKey(0)
    kx, kp = jax.random.split(key)
    edge_emb_eq1 = jax.random.normal(kx, (N, INPUT_DIM), jnp.float32)

    # Deterministic edge_index [2, E]: row 0 = source, row 1 = target; no self-loops / duplicates.
    src, dst = [], []
    for i in range(N):
        for d in (1, 2, 5):
            src.append((i + d) % N)
            dst.append(i)
    edge_index = jnp.array([src, dst], dtype=jnp.int32)          # [2, 48]

    # Dense adjacency: adj[i, j] = 1 iff edge j -> i (PyG flow='source_to_target').
    adj = jnp.zeros((N, N), jnp.float32).at[edge_index[1], edge_index[0]].set(1.0)

    params = init_params(kp, INPUT_DIM, HIDDEN_DIM, NUM_LAYERS)
    packed, out_dim = pack_params(params, NUM_LAYERS)            # one-time packing, off hot path

    mu, logvar = transformer_conv_encoder(packed, edge_emb_eq1, adj, out_dim=out_dim)
    jax.block_until_ready((mu, logvar))

    # Pure-JAX reference (un-fused, mirrors the PyTorch module) for correctness.
    adj_sl = adj + jnp.eye(N, dtype=jnp.float32)

    def ref_forward(params, x):
        def tconv(x, p):
            q = x @ p["wq"] + p["bq"]
            k = x @ p["wk"] + p["bk"]
            v = x @ p["wv"] + p["bv"]
            s = (q @ k.T) / math.sqrt(q.shape[-1])
            masked = jnp.where(adj > 0, s, -1e30)
            pm = jnp.where(adj > 0, jnp.exp(masked - masked.max(-1, keepdims=True)), 0.0)
            den = pm.sum(-1, keepdims=True)
            alpha = pm / jnp.where(den > 0, den, 1.0)
            return alpha @ v + x @ p["ws"] + p["bs"]

        def gcn(x, p, relu=False):
            deg = adj_sl.sum(-1, keepdims=True)
            dinv = 1.0 / jnp.sqrt(deg)
            out = dinv * (adj_sl @ (dinv * (x @ p["w"]))) + p["b"]
            return jnp.maximum(out, 0.0) if relu else out

        h = x
        for l in range(NUM_LAYERS):
            h = tconv(h, params["encoder"][l])
        h = gcn(h, params["gcn_shared"], relu=True)
        return gcn(h, params["gcn_mu"]), gcn(h, params["gcn_logvar"])

    mu_ref, lv_ref = ref_forward(params, edge_emb_eq1)
    # approx reciprocal (EUP vrcp) loosens the match slightly -> 2e-3 tolerance.
    assert jnp.allclose(mu, mu_ref, atol=2e-3, rtol=2e-3), float(jnp.abs(mu - mu_ref).max())
    assert jnp.allclose(logvar, lv_ref, atol=2e-3, rtol=2e-3), float(jnp.abs(logvar - lv_ref).max())
    print("KERNEL_OK")
</pallas_src>

<mosaic_0001>
module attributes {stable_mosaic.version = 11 : i64} {
  func.func @_fused_encoder_kernel(%arg0: memref<16x128xf32, #tpu.memory_space<vmem>>, %arg1: memref<16x16xf32, #tpu.memory_space<vmem>>, %arg2: memref<2x128x512xf32, #tpu.memory_space<vmem>>, %arg3: memref<2x1x512xf32, #tpu.memory_space<vmem>>, %arg4: memref<2x128x128xf32, #tpu.memory_space<vmem>>, %arg5: memref<2x1x128xf32, #tpu.memory_space<vmem>>, %arg6: memref<16x128xf32, #tpu.memory_space<vmem>>) attributes {dimension_semantics = [], scalar_prefetch = 0 : i64, scratch_operands = 0 : i64, tpu.core_type = #tpu.core_type<tc>} {
    %c0 = arith.constant 0 : index
    %c0_0 = arith.constant 0 : index
    %0 = vector.load %arg1[%c0, %c0_0] : memref<16x16xf32, #tpu.memory_space<vmem>>, vector<16x16xf32>
    %cst = arith.constant 0.000000e+00 : f32
    %1 = vector.broadcast %cst : f32 to vector<16x16xf32>
    %2 = arith.cmpf ogt, %0, %1 : vector<16x16xf32>
    %3 = tpu.iota {dimensions = array<i32: 0>} : vector<16x16xi32>
    %4 = tpu.iota {dimensions = array<i32: 1>} : vector<16x16xi32>
    %5 = arith.cmpi eq, %3, %4 : vector<16x16xi32>
    %6 = arith.extui %5 : vector<16x16xi1> to vector<16x16xi32>
    %7 = arith.sitofp %6 : vector<16x16xi32> to vector<16x16xf32>
    %8 = arith.addf %0, %7 : vector<16x16xf32>
    %cst_1 = arith.constant dense<0.000000e+00> : vector<16xf32>
    %9 = vector.multi_reduction <add>, %8, %cst_1 [1] : vector<16x16xf32> to vector<16xf32>
    %10 = vector.shape_cast %9 : vector<16xf32> to vector<16x1xf32>
    %cst_2 = arith.constant 0.000000e+00 : f32
    %11 = vector.broadcast %cst_2 : f32 to vector<16x1xf32>
    %12 = arith.cmpf ogt, %10, %11 : vector<16x1xf32>
    %13 = math.rsqrt %10 : vector<16x1xf32>
    %cst_3 = arith.constant 0.000000e+00 : f32
    %14 = vector.broadcast %cst_3 : f32 to vector<16x1xf32>
    %15 = arith.select %12, %13, %14 : vector<16x1xi1>, vector<16x1xf32>
    %c0_4 = arith.constant 0 : index
    %c0_5 = arith.constant 0 : index
    %16 = vector.load %arg0[%c0_4, %c0_5] : memref<16x128xf32, #tpu.memory_space<vmem>>, vector<16x128xf32>
    %c0_6 = arith.constant 0 : index
    %c0_7 = arith.constant 0 : index
    %c0_8 = arith.constant 0 : index
    %17 = vector.load %arg2[%c0_6, %c0_7, %c0_8] : memref<2x128x512xf32, #tpu.memory_space<vmem>>, vector<1x128x512xf32>
    %18 = vector.shape_cast %17 : vector<1x128x512xf32> to vector<128x512xf32>
    %c0_9 = arith.constant 0 : index
    %c0_10 = arith.constant 0 : index
    %c0_11 = arith.constant 0 : index
    %19 = vector.load %arg3[%c0_9, %c0_10, %c0_11] : memref<2x1x512xf32, #tpu.memory_space<vmem>>, vector<1x1x512xf32>
    %20 = vector.shape_cast %19 : vector<1x1x512xf32> to vector<1x512xf32>
    %cst_12 = arith.constant dense<0.000000e+00> : vector<16x512xf32>
    %21 = tpu.matmul %16, %18, %cst_12 {dimension_numbers = #tpu.dot_dimension_numbers<[1], [0], [0], [1], [0, 0, 1, 1], [], []>} : vector<16x128xf32>, vector<128x512xf32>, vector<16x512xf32> -> vector<16x512xf32>
    %22 = vector.broadcast %20 : vector<1x512xf32> to vector<16x512xf32>
    %23 = arith.addf %21, %22 : vector<16x512xf32>
    %24 = vector.extract_strided_slice %23 {offsets = [0, 0], sizes = [16, 128], strides = [1, 1]} : vector<16x512xf32> to vector<16x128xf32>
    %25 = vector.extract_strided_slice %23 {offsets = [0, 128], sizes = [16, 128], strides = [1, 1]} : vector<16x512xf32> to vector<16x128xf32>
    %26 = vector.extract_strided_slice %23 {offsets = [0, 256], sizes = [16, 128], strides = [1, 1]} : vector<16x512xf32> to vector<16x128xf32>
    %27 = vector.extract_strided_slice %23 {offsets = [0, 384], sizes = [16, 128], strides = [1, 1]} : vector<16x512xf32> to vector<16x128xf32>
    %cst_13 = arith.constant dense<0.000000e+00> : vector<16x16xf32>
    %28 = tpu.matmul %24, %25, %cst_13 {dimension_numbers = #tpu.dot_dimension_numbers<[1], [1], [0], [0], [0, 0, 1, 0], [], []>} : vector<16x128xf32>, vector<16x128xf32>, vector<16x16xf32> -> vector<16x16xf32>
    %cst_14 = arith.constant -1.000000e+30 : f32
    %29 = vector.broadcast %cst_14 : f32 to vector<16x16xf32>
    %30 = arith.select %2, %28, %29 : vector<16x16xi1>, vector<16x16xf32>
    %cst_15 = arith.constant dense<0xFF800000> : vector<16xf32>
    %31 = vector.multi_reduction <maximumf>, %30, %cst_15 [1] : vector<16x16xf32> to vector<16xf32>
    %32 = vector.shape_cast %31 : vector<16xf32> to vector<16x1xf32>
    %33 = vector.broadcast %32 : vector<16x1xf32> to vector<16x16xf32>
    %34 = arith.subf %30, %33 : vector<16x16xf32>
    %35 = math.exp %34 : vector<16x16xf32>
    %cst_16 = arith.constant 0.000000e+00 : f32
    %36 = vector.broadcast %cst_16 : f32 to vector<16x16xf32>
    %37 = arith.select %2, %35, %36 : vector<16x16xi1>, vector<16x16xf32>
    %cst_17 = arith.constant dense<0.000000e+00> : vector<16xf32>
    %38 = vector.multi_reduction <add>, %37, %cst_17 [1] : vector<16x16xf32> to vector<16xf32>
    %39 = vector.shape_cast %38 : vector<16xf32> to vector<16x1xf32>
    %cst_18 = arith.constant 0.000000e+00 : f32
    %40 = vector.broadcast %cst_18 : f32 to vector<16x1xf32>
    %41 = arith.cmpf ogt, %39, %40 : vector<16x1xf32>
    %cst_19 = arith.constant 1.000000e+00 : f32
    %42 = vector.broadcast %cst_19 : f32 to vector<16x1xf32>
    %43 = arith.select %41, %39, %42 : vector<16x1xi1>, vector<16x1xf32>
    %44 = tpu.reciprocal %43 {approx = true} : vector<16x1xf32> -> vector<16x1xf32>
    %cst_20 = arith.constant dense<0.000000e+00> : vector<16x128xf32>
    %45 = tpu.matmul %37, %26, %cst_20 {dimension_numbers = #tpu.dot_dimension_numbers<[1], [0], [0], [1], [0, 0, 1, 1], [], []>} : vector<16x16xf32>, vector<16x128xf32>, vector<16x128xf32> -> vector<16x128xf32>
    %46 = vector.broadcast %44 : vector<16x1xf32> to vector<16x128xf32>
    %47 = arith.mulf %45, %46 : vector<16x128xf32>
    %48 = arith.addf %47, %27 : vector<16x128xf32>
    %c1 = arith.constant 1 : index
    %c0_21 = arith.constant 0 : index
    %c0_22 = arith.constant 0 : index
    %49 = vector.load %arg2[%c1, %c0_21, %c0_22] : memref<2x128x512xf32, #tpu.memory_space<vmem>>, vector<1x128x512xf32>
    %50 = vector.shape_cast %49 : vector<1x128x512xf32> to vector<128x512xf32>
    %c1_23 = arith.constant 1 : index
    %c0_24 = arith.constant 0 : index
    %c0_25 = arith.constant 0 : index
    %51 = vector.load %arg3[%c1_23, %c0_24, %c0_25] : memref<2x1x512xf32, #tpu.memory_space<vmem>>, vector<1x1x512xf32>
    %52 = vector.shape_cast %51 : vector<1x1x512xf32> to vector<1x512xf32>
    %cst_26 = arith.constant dense<0.000000e+00> : vector<16x512xf32>
    %53 = tpu.matmul %48, %50, %cst_26 {dimension_numbers = #tpu.dot_dimension_numbers<[1], [0], [0], [1], [0, 0, 1, 1], [], []>} : vector<16x128xf32>, vector<128x512xf32>, vector<16x512xf32> -> vector<16x512xf32>
    %54 = vector.broadcast %52 : vector<1x512xf32> to vector<16x512xf32>
    %55 = arith.addf %53, %54 : vector<16x512xf32>
    %56 = vector.extract_strided_slice %55 {offsets = [0, 0], sizes = [16, 128], strides = [1, 1]} : vector<16x512xf32> to vector<16x128xf32>
    %57 = vector.extract_strided_slice %55 {offsets = [0, 128], sizes = [16, 128], strides = [1, 1]} : vector<16x512xf32> to vector<16x128xf32>
    %58 = vector.extract_strided_slice %55 {offsets = [0, 256], sizes = [16, 128], strides = [1, 1]} : vector<16x512xf32> to vector<16x128xf32>
    %59 = vector.extract_strided_slice %55 {offsets = [0, 384], sizes = [16, 128], strides = [1, 1]} : vector<16x512xf32> to vector<16x128xf32>
    %cst_27 = arith.constant dense<0.000000e+00> : vector<16x16xf32>
    %60 = tpu.matmul %56, %57, %cst_27 {dimension_numbers = #tpu.dot_dimension_numbers<[1], [1], [0], [0], [0, 0, 1, 0], [], []>} : vector<16x128xf32>, vector<16x128xf32>, vector<16x16xf32> -> vector<16x16xf32>
    %cst_28 = arith.constant -1.000000e+30 : f32
    %61 = vector.broadcast %cst_28 : f32 to vector<16x16xf32>
    %62 = arith.select %2, %60, %61 : vector<16x16xi1>, vector<16x16xf32>
    %cst_29 = arith.constant dense<0xFF800000> : vector<16xf32>
    %63 = vector.multi_reduction <maximumf>, %62, %cst_29 [1] : vector<16x16xf32> to vector<16xf32>
    %64 = vector.shape_cast %63 : vector<16xf32> to vector<16x1xf32>
    %65 = vector.broadcast %64 : vector<16x1xf32> to vector<16x16xf32>
    %66 = arith.subf %62, %65 : vector<16x16xf32>
    %67 = math.exp %66 : vector<16x16xf32>
    %cst_30 = arith.constant 0.000000e+00 : f32
    %68 = vector.broadcast %cst_30 : f32 to vector<16x16xf32>
    %69 = arith.select %2, %67, %68 : vector<16x16xi1>, vector<16x16xf32>
    %cst_31 = arith.constant dense<0.000000e+00> : vector<16xf32>
    %70 = vector.multi_reduction <add>, %69, %cst_31 [1] : vector<16x16xf32> to vector<16xf32>
    %71 = vector.shape_cast %70 : vector<16xf32> to vector<16x1xf32>
    %cst_32 = arith.constant 0.000000e+00 : f32
    %72 = vector.broadcast %cst_32 : f32 to vector<16x1xf32>
    %73 = arith.cmpf ogt, %71, %72 : vector<16x1xf32>
    %cst_33 = arith.constant 1.000000e+00 : f32
    %74 = vector.broadcast %cst_33 : f32 to vector<16x1xf32>
    %75 = arith.select %73, %71, %74 : vector<16x1xi1>, vector<16x1xf32>
    %76 = tpu.reciprocal %75 {approx = true} : vector<16x1xf32> -> vector<16x1xf32>
    %cst_34 = arith.constant dense<0.000000e+00> : vector<16x128xf32>
    %77 = tpu.matmul %69, %58, %cst_34 {dimension_numbers = #tpu.dot_dimension_numbers<[1], [0], [0], [1], [0, 0, 1, 1], [], []>} : vector<16x16xf32>, vector<16x128xf32>, vector<16x128xf32> -> vector<16x128xf32>
    %78 = vector.broadcast %76 : vector<16x1xf32> to vector<16x128xf32>
    %79 = arith.mulf %77, %78 : vector<16x128xf32>
    %80 = arith.addf %79, %59 : vector<16x128xf32>
    %c0_35 = arith.constant 0 : index
    %c0_36 = arith.constant 0 : index
    %c0_37 = arith.constant 0 : index
    %81 = vector.load %arg4[%c0_35, %c0_36, %c0_37] : memref<2x128x128xf32, #tpu.memory_space<vmem>>, vector<1x128x128xf32>
    %82 = vector.shape_cast %81 : vector<1x128x128xf32> to vector<128x128xf32>
    %cst_38 = arith.constant dense<0.000000e+00> : vector<16x128xf32>
    %83 = tpu.matmul %80, %82, %cst_38 {dimension_numbers = #tpu.dot_dimension_numbers<[1], [0], [0], [1], [0, 0, 1, 1], [], []>} : vector<16x128xf32>, vector<128x128xf32>, vector<16x128xf32> -> vector<16x128xf32>
    %84 = vector.broadcast %15 : vector<16x1xf32> to vector<16x128xf32>
    %85 = arith.mulf %84, %83 : vector<16x128xf32>
    %cst_39 = arith.constant dense<0.000000e+00> : vector<16x128xf32>
    %86 = tpu.matmul %8, %85, %cst_39 {dimension_numbers = #tpu.dot_dimension_numbers<[1], [0], [0], [1], [0, 0, 1, 1], [], []>} : vector<16x16xf32>, vector<16x128xf32>, vector<16x128xf32> -> vector<16x128xf32>
    %87 = vector.broadcast %15 : vector<16x1xf32> to vector<16x128xf32>
    %88 = arith.mulf %87, %86 : vector<16x128xf32>
    %c0_40 = arith.constant 0 : index
    %c0_41 = arith.constant 0 : index
    %c0_42 = arith.constant 0 : index
    %89 = vector.load %arg5[%c0_40, %c0_41, %c0_42] : memref<2x1x128xf32, #tpu.memory_space<vmem>>, vector<1x1x128xf32>
    %90 = vector.shape_cast %89 : vector<1x1x128xf32> to vector<1x128xf32>
    %91 = vector.broadcast %90 : vector<1x128xf32> to vector<16x128xf32>
    %92 = arith.addf %88, %91 : vector<16x128xf32>
    %cst_43 = arith.constant 0.000000e+00 : f32
    %93 = vector.broadcast %cst_43 : f32 to vector<16x128xf32>
    %94 = arith.maximumf %92, %93 : vector<16x128xf32>
    %c1_44 = arith.constant 1 : index
    %c0_45 = arith.constant 0 : index
    %c0_46 = arith.constant 0 : index
    %95 = vector.load %arg4[%c1_44, %c0_45, %c0_46] : memref<2x128x128xf32, #tpu.memory_space<vmem>>, vector<1x128x128xf32>
    %96 = vector.shape_cast %95 : vector<1x128x128xf32> to vector<128x128xf32>
    %cst_47 = arith.constant dense<0.000000e+00> : vector<16x128xf32>
    %97 = tpu.matmul %94, %96, %cst_47 {dimension_numbers = #tpu.dot_dimension_numbers<[1], [0], [0], [1], [0, 0, 1, 1], [], []>} : vector<16x128xf32>, vector<128x128xf32>, vector<16x128xf32> -> vector<16x128xf32>
    %98 = vector.broadcast %15 : vector<16x1xf32> to vector<16x128xf32>
    %99 = arith.mulf %98, %97 : vector<16x128xf32>
    %cst_48 = arith.constant dense<0.000000e+00> : vector<16x128xf32>
    %100 = tpu.matmul %8, %99, %cst_48 {dimension_numbers = #tpu.dot_dimension_numbers<[1], [0], [0], [1], [0, 0, 1, 1], [], []>} : vector<16x16xf32>, vector<16x128xf32>, vector<16x128xf32> -> vector<16x128xf32>
    %101 = vector.broadcast %15 : vector<16x1xf32> to vector<16x128xf32>
    %102 = arith.mulf %101, %100 : vector<16x128xf32>
    %c1_49 = arith.constant 1 : index
    %c0_50 = arith.constant 0 : index
    %c0_51 = arith.constant 0 : index
    %103 = vector.load %arg5[%c1_49, %c0_50, %c0_51] : memref<2x1x128xf32, #tpu.memory_space<vmem>>, vector<1x1x128xf32>
    %104 = vector.shape_cast %103 : vector<1x1x128xf32> to vector<1x128xf32>
    %105 = vector.broadcast %104 : vector<1x128xf32> to vector<16x128xf32>
    %106 = arith.addf %102, %105 : vector<16x128xf32>
    %c0_52 = arith.constant 0 : index
    %c0_53 = arith.constant 0 : index
    %107 = vector.load %arg6[%c0_52, %c0_53] : memref<16x128xf32, #tpu.memory_space<vmem>>, vector<16x128xf32>
    tpu.vector_store %arg6[%c0_52, %c0_53], %106 {strides = array<i32>} : memref<16x128xf32, #tpu.memory_space<vmem>>, vector<16x128xf32>,
    return
  }
}

</mosaic_0001>

<bundles_post_ra>
// kernel: transformer_conv_encoder.1
= control target key start
LH: loop header
LB: loop body
LE: loop exit
PB: predicated region body
PF: predicated region fallthrough
CT: control target
= control target key end

     0   :  { %11 = vsyncpa [#allocation3], 0  ;;  %s1773_s0 = inlined_call_operand.vmem [shape: f32[16,128], index: 0, kind: input, shape index: {}]   ;;  %s1774_s1 = inlined_call_operand.vmem [shape: f32[16,16], index: 1, kind: input, shape index: {}]   ;;  %s1775_s2 = inlined_call_operand.hbm [shape: f32[2,128,512], index: 2, kind: input, shape index: {}]   ;;  %s1776_s3 = inlined_call_operand.vmem [shape: f32[2,1,512], index: 3, kind: input, shape index: {}]   ;;  %s1777_s4 = inlined_call_operand.hbm [shape: f32[2,128,128], index: 4, kind: input, shape index: {}]   ;;  %s1778_s5 = inlined_call_operand.vmem [shape: f32[2,1,128], index: 5, kind: input, shape index: {}]   ;;  %s1779_s6 = inlined_call_operand.vmem [shape: f32[16,128], index: 6, kind: output, shape index: {}]  }
   0x1   :  { %12 = vsyncpa [#allocation5], 0  ;;  %s1574_s21 = smov [#allocation2]  }
   0x2   :  { %s22_s22 = sshll.u32 %s1574_s21, 4  ;;  %s23_s22 = int_to_ptr.vmem [resolvable:$true] %s22_s22 }
   0x3   :  { %s1538_s23 = scalar_lea.vmem %s23_s22, 16384  ;;  %p1543_p1 = scmp.lt.s32.totalorder %s23_s22, %s23_s22 }
   0x4   :  { %p1539_p0 = scmp.ne.s32.totalorder %s23_s22, %s1538_s23  ;;  %p1544_p2 = scmp.lt.s32.totalorder %s1538_s23, %s1538_s23 }
   0x6   :  { %p1545_p3 = por %p1544_p2, %p1543_p1 }
   0x8   :  { %p1546_p4 = pnand %p1545_p3, %p1539_p0 }
   0xa   :  { %1549 = shalt.err (!%p1546_p4)
}
   0xb   :  { %s1575_s24 = smov 512   ;;  %s1576_s25 = smov 32  }
   0xc   :  { %28 = dma.hbm_to_vmem [thread:$0]  %s1775_s2, 16384, %s23_s22, [#allocation3], %s1575_s24, %s1575_s24, %s1576_s25  }
   0xd   :  { %s1577_s28 = smov [#allocation4]  }
   0xe   :  { %s36_s29 = sshll.u32 %s1577_s28, 4  ;;  %s37_s29 = int_to_ptr.vmem [resolvable:$true] %s36_s29 }
   0xf   :  { %s1558_s30 = scalar_lea.vmem %s37_s29, 4096  ;;  %p1563_p6 = scmp.lt.s32.totalorder %s37_s29, %s37_s29 }
  0x10   :  { %p1559_p5 = scmp.ne.s32.totalorder %s37_s29, %s1558_s30  ;;  %p1564_p7 = scmp.lt.s32.totalorder %s1558_s30, %s1558_s30 }
  0x12   :  { %p1565_p8 = por %p1564_p7, %p1563_p6 }
  0x14   :  { %p1566_p9 = pnand %p1565_p8, %p1559_p5 }
  0x16   :  { %1569 = shalt.err (!%p1566_p9)
}
  0x17   :  { %s1578_s7 = smov 128   ;;  %s1579_s8 = smov 8  }
  0x18   :  { %42 = dma.hbm_to_vmem [thread:$0]  %s1777_s4, 4096, %s37_s29, [#allocation5], %s1578_s7, %s1578_s7, %s1579_s8  }
  0x19   :  { %1570 = dma.done.wait [#allocation3], 16384  }
  0x1a   :  { %1571 = vsyncadd [#allocation3], 4294950912 }
  0x1b   :  { %1572 = dma.done.wait [#allocation5], 4096  }
  0x1c   :  { %1573 = vsyncadd [#allocation5], 4294963200  ;;  %v1580_v0 = vmov 0.0   ;;  %v144_v1 = vld [vmem:[#allocation2 + $0x1e8] sm:$0xff]  ;;  %v143_v2 = vld [vmem:[#allocation2 + $0x1e0] sm:$0xff]  ;;  %vm68_vm2 = vcmask 130048  }
  0x1d   :  { %233 = vmatprep.mubr.f32.mxu0 %v1580_v0  ;;  %310 = vmatprep.mubr.f32.mxu1 %v1580_v0  ;;  %v140_v3 = vld [vmem:[#allocation2 + $0x1c8] sm:$0xff]  ;;  %v139_v4 = vld [vmem:[#allocation2 + $0x1c0] sm:$0xff]  ;;  %v146_v35 = vld [vmem:[#allocation2 + $0x1f8] sm:$0xff] }
  0x1e   :  { %169 = vmatprep.subr.mxu0 %v144_v1  ;;  %v136_v5 = vld [vmem:[#allocation2 + $0x1a8] sm:$0xff]  ;;  %v135_v6 = vld [vmem:[#allocation2 + $0x1a0] sm:$0xff]  ;;  %v145_v36 = vld [vmem:[#allocation2 + $0x1f0] sm:$0xff]  ;;  %246 = vmatprep.subr.mxu1 %v146_v35 }
  0x1f   :  { %170 = vmatpush1.msra.mxu0 %v143_v2  ;;  %v132_v7 = vld [vmem:[#allocation2 + $0x188] sm:$0xff]  ;;  %v131_v8 = vld [vmem:[#allocation2 + $0x180] sm:$0xff]  ;;  %v142_v37 = vld [vmem:[#allocation2 + $0x1d8] sm:$0xff]  ;;  %247 = vmatpush1.msra.mxu1 %v145_v36 }
  0x20   :  { %171 = vmatprep.subr.mxu0 %v140_v3  ;;  %v128_v9 = vld [vmem:[#allocation2 + $0x168] sm:$0xff]  ;;  %v127_v10 = vld [vmem:[#allocation2 + $0x160] sm:$0xff]  ;;  %v141_v38 = vld [vmem:[#allocation2 + $0x1d0] sm:$0xff]  ;;  %248 = vmatprep.subr.mxu1 %v142_v37 }
  0x21   :  { %172 = vmatpush1.msra.mxu0 %v139_v4  ;;  %v124_v11 = vld [vmem:[#allocation2 + $0x148] sm:$0xff]  ;;  %v123_v12 = vld [vmem:[#allocation2 + $0x140] sm:$0xff]  ;;  %v138_v39 = vld [vmem:[#allocation2 + $0x1b8] sm:$0xff]  ;;  %249 = vmatpush1.msra.mxu1 %v141_v38  ;;  %v55_v4 = vlaneseq }
  0x22   :  { %173 = vmatprep.subr.mxu0 %v136_v5  ;;  %v120_v13 = vld [vmem:[#allocation2 + $0x128] sm:$0xff]  ;;  %v119_v14 = vld [vmem:[#allocation2 + $0x120] sm:$0xff]  ;;  %v137_v40 = vld [vmem:[#allocation2 + $0x1b0] sm:$0xff]  ;;  %250 = vmatprep.subr.mxu1 %v138_v39 }
  0x23   :  { %174 = vmatpush1.msra.mxu0 %v135_v6  ;;  %v116_v15 = vld [vmem:[#allocation2 + $0x108] sm:$0xff]  ;;  %v115_v16 = vld [vmem:[#allocation2 + $0x100] sm:$0xff]  ;;  %v134_v41 = vld [vmem:[#allocation2 + $0x198] sm:$0xff]  ;;  %251 = vmatpush1.msra.mxu1 %v137_v40  ;;  %v1641_v5 = vshrl.u32 %v55_v4, 7 }
  0x24   :  { %175 = vmatprep.subr.mxu0 %v132_v7  ;;  %v112_v17 = vld [vmem:[#allocation2 + $0xe8] sm:$0xff]  ;;  %v111_v18 = vld [vmem:[#allocation2 + $0xe0] sm:$0xff]  ;;  %v133_v42 = vld [vmem:[#allocation2 + $0x190] sm:$0xff]  ;;  %252 = vmatprep.subr.mxu1 %v134_v41 }
  0x25   :  { %176 = vmatpush1.msra.mxu0 %v131_v8  ;;  %v108_v19 = vld [vmem:[#allocation2 + $0xc8] sm:$0xff]  ;;  %v107_v20 = vld [vmem:[#allocation2 + $0xc0] sm:$0xff]  ;;  %v130_v43 = vld [vmem:[#allocation2 + $0x178] sm:$0xff]  ;;  %253 = vmatpush1.msra.mxu1 %v133_v42  ;;  %v151_v6 = vsub.s32 0, %v1641_v5 }
  0x26   :  { %177 = vmatprep.subr.mxu0 %v128_v9  ;;  %v104_v21 = vld [vmem:[#allocation2 + $0xa8] sm:$0xff]  ;;  %v103_v22 = vld [vmem:[#allocation2 + $0xa0] sm:$0xff]  ;;  %v129_v44 = vld [vmem:[#allocation2 + $0x170] sm:$0xff]  ;;  %254 = vmatprep.subr.mxu1 %v130_v43 }
  0x27   :  { %178 = vmatpush1.msra.mxu0 %v127_v10  ;;  %v100_v23 = vld [vmem:[#allocation2 + $0x88] sm:$0xff]  ;;  %v99_v24 = vld [vmem:[#allocation2 + $0x80] sm:$0xff]  ;;  %v126_v45 = vld [vmem:[#allocation2 + $0x158] sm:$0xff]  ;;  %255 = vmatpush1.msra.mxu1 %v129_v44 }
  0x28   :  { %179 = vmatprep.subr.mxu0 %v124_v11  ;;  %v96_v25 = vld [vmem:[#allocation2 + $0x68] sm:$0xff]  ;;  %v95_v26 = vld [vmem:[#allocation2 + $0x60] sm:$0xff]  ;;  %v125_v46 = vld [vmem:[#allocation2 + $0x150] sm:$0xff]  ;;  %256 = vmatprep.subr.mxu1 %v126_v45  ;;  %v155_v11 = vsub.s32 1, %v1641_v5 }
  0x29   :  { %180 = vmatpush1.msra.mxu0 %v123_v12  ;;  %v92_v27 = vld [vmem:[#allocation2 + $0x48] sm:$0xff]  ;;  %v91_v28 = vld [vmem:[#allocation2 + $0x40] sm:$0xff]  ;;  %v122_v47 = vld [vmem:[#allocation2 + $0x138] sm:$0xff]  ;;  %257 = vmatpush1.msra.mxu1 %v125_v46 }
  0x2a   :  { %181 = vmatprep.subr.mxu0 %v120_v13  ;;  %v88_v29 = vld [vmem:[#allocation2 + $0x28] sm:$0xff]  ;;  %v87_v30 = vld [vmem:[#allocation2 + $0x20] sm:$0xff]  ;;  %v121_v48 = vld [vmem:[#allocation2 + $0x130] sm:$0xff]  ;;  %258 = vmatprep.subr.mxu1 %v122_v47 }
  0x2b   :  { %182 = vmatpush1.msra.mxu0 %v119_v14  ;;  %v84_v31 = vld [vmem:[#allocation2 + $0x8] sm:$0xff]  ;;  %v83_v32 = vld [vmem:[#allocation2] sm:$0xff]  ;;  %v118_v49 = vld [vmem:[#allocation2 + $0x118] sm:$0xff]  ;;  %259 = vmatpush1.msra.mxu1 %v121_v48 }
  0x2c   :  { %183 = vmatprep.subr.mxu0 %v116_v15  ;;  %v1627_v33 = vld [vmem:[%s1773_s0] sm:$0xff]  ;;  %v1634_v34 = vld [vmem:[%s1773_s0 + $0x8] sm:$0xff]  ;;  %v117_v50 = vld [vmem:[#allocation2 + $0x110] sm:$0xff]  ;;  %260 = vmatprep.subr.mxu1 %v118_v49 }
  0x2d   :  { %184 = vmatpush1.msra.mxu0 %v115_v16  ;;  %v114_v51 = vld [vmem:[#allocation2 + $0xf8] sm:$0xff]  ;;  %v113_v52 = vld [vmem:[#allocation2 + $0xf0] sm:$0xff]  ;;  %261 = vmatpush1.msra.mxu1 %v117_v50  ;;  %v1647_v7 = vld [vmem:[%s1776_s3] sm:$0xf] }
  0x2e   :  { %185 = vmatprep.subr.mxu0 %v112_v17  ;;  %v110_v53 = vld [vmem:[#allocation2 + $0xd8] sm:$0xff]  ;;  %262 = vmatprep.subr.mxu1 %v114_v51  ;;  %v109_v54 = vld [vmem:[#allocation2 + $0xd0] sm:$0xff]  ;;  %v152_v8 = vrot.slane %v1647_v7, %v151_v6  ;;  %v156_v14 = vrot.slane %v1647_v7, %v155_v11  ;;  %v573_v46 = vld [vmem:[#allocation2 + $0x3e8] sm:$0xff] }
  0x2f   :  { %186 = vmatpush1.msra.mxu0 %v111_v18  ;;  %263 = vmatpush1.msra.mxu1 %v113_v52  ;;  %v106_v55 = vld [vmem:[#allocation2 + $0xb8] sm:$0xff]  ;;  %v105_v56 = vld [vmem:[#allocation2 + $0xb0] sm:$0xff]  ;;  %v572_v48 = vld [vmem:[#allocation2 + $0x3e0] sm:$0xff] }
  0x30   :  { %187 = vmatprep.subr.mxu0 %v108_v19  ;;  %264 = vmatprep.subr.mxu1 %v110_v53  ;;  %v102_v57 = vld [vmem:[#allocation2 + $0x98] sm:$0xff]  ;;  %v101_v58 = vld [vmem:[#allocation2 + $0x90] sm:$0xff]  ;;  %v1660_v19 = vld [vmem:[%s1774_s1] sm:$0xff] }
  0x31   :  { %188 = vmatpush1.msra.mxu0 %v107_v20  ;;  %265 = vmatpush1.msra.mxu1 %v109_v54  ;;  %v98_v59 = vld [vmem:[#allocation2 + $0x78] sm:$0xff]  ;;  %v97_v60 = vld [vmem:[#allocation2 + $0x70] sm:$0xff]  ;;  %v1665_v20 = vld [vmem:[%s1774_s1 + $0x8] sm:$0xff]  ;;  %vm53_vm0 = vcmp.gt.f32.partialorder %v1660_v19, 0.0 }
  0x32   :  { %189 = vmatprep.subr.mxu0 %v104_v21  ;;  %266 = vmatprep.subr.mxu1 %v106_v55  ;;  %v94_v61 = vld [vmem:[#allocation2 + $0x58] sm:$0xff]  ;;  %v93_v62 = vld [vmem:[#allocation2 + $0x50] sm:$0xff]  ;;  %vm54_vm1 = vcmp.gt.f32.partialorder %v1665_v20, 0.0  ;;  %v569_v50 = vld [vmem:[#allocation2 + $0x3c8] sm:$0xff] }
  0x33   :  { %190 = vmatpush1.msra.mxu0 %v103_v22  ;;  %267 = vmatpush1.msra.mxu1 %v105_v56  ;;  %v90_v63 = vld [vmem:[#allocation2 + $0x38] sm:$0xff]  ;;  %v89_v1 = vld [vmem:[#allocation2 + $0x30] sm:$0xff]  ;;  %v568_v52 = vld [vmem:[#allocation2 + $0x3c0] sm:$0xff] }
  0x34   :  { %191 = vmatprep.subr.mxu0 %v100_v23  ;;  %268 = vmatprep.subr.mxu1 %v102_v57  ;;  %v86_v2 = vld [vmem:[#allocation2 + $0x18] sm:$0xff]  ;;  %v85_v3 = vld [vmem:[#allocation2 + $0x10] sm:$0xff]  ;;  %v565_v54 = vld [vmem:[#allocation2 + $0x3a8] sm:$0xff] }
  0x35   :  { %192 = vmatpush1.msra.mxu0 %v99_v24  ;;  %269 = vmatpush1.msra.mxu1 %v101_v58  ;;  %v575_v47 = vld [vmem:[#allocation2 + $0x3f8] sm:$0xff]  ;;  %v574_v49 = vld [vmem:[#allocation2 + $0x3f0] sm:$0xff]  ;;  %v564_v56 = vld [vmem:[#allocation2 + $0x3a0] sm:$0xff] }
  0x36   :  { %193 = vmatprep.subr.mxu0 %v96_v25  ;;  %270 = vmatprep.subr.mxu1 %v98_v59  ;;  %v571_v51 = vld [vmem:[#allocation2 + $0x3d8] sm:$0xff]  ;;  %v570_v53 = vld [vmem:[#allocation2 + $0x3d0] sm:$0xff]  ;;  %v561_v58 = vld [vmem:[#allocation2 + $0x388] sm:$0xff] }
  0x37   :  { %194 = vmatpush1.msra.mxu0 %v95_v26  ;;  %271 = vmatpush1.msra.mxu1 %v97_v60  ;;  %v567_v55 = vld [vmem:[#allocation2 + $0x3b8] sm:$0xff]  ;;  %v566_v57 = vld [vmem:[#allocation2 + $0x3b0] sm:$0xff]  ;;  %v560_v60 = vld [vmem:[#allocation2 + $0x380] sm:$0xff] }
  0x38   :  { %195 = vmatprep.subr.mxu0 %v92_v27  ;;  %272 = vmatprep.subr.mxu1 %v94_v61  ;;  %v159_v27 = vsub.s32 2, %v1641_v5  ;;  %v563_v59 = vld [vmem:[#allocation2 + $0x398] sm:$0xff]  ;;  %v562_v61 = vld [vmem:[#allocation2 + $0x390] sm:$0xff] }
  0x39   :  { %196 = vmatpush1.msra.mxu0 %v91_v28  ;;  %273 = vmatpush1.msra.mxu1 %v93_v62  ;;  %v557_v62 = vld [vmem:[#allocation2 + $0x368] sm:$0xff] }
  0x3a   :  { %197 = vmatprep.subr.mxu0 %v88_v29  ;;  %274 = vmatprep.subr.mxu1 %v90_v63  ;;  %v160_v29 = vrot.slane %v1647_v7, %v159_v27  ;;  %v559_v63 = vld [vmem:[#allocation2 + $0x378] sm:$0xff] }
  0x3b   :  { %198 = vmatpush1.msra.mxu0 %v87_v30  ;;  %275 = vmatpush1.msra.mxu1 %v89_v1  ;;  %v556_v1 = vld [vmem:[#allocation2 + $0x360] sm:$0xff] }
  0x3c   :  { %199 = vmatprep.subr.mxu0 %v84_v31  ;;  %276 = vmatprep.subr.mxu1 %v86_v2  ;;  %v558_v2 = vld [vmem:[#allocation2 + $0x370] sm:$0xff] }
  0x3d   :  { %200 = vmatpush1.msra.mxu0 %v83_v32  ;;  %277 = vmatpush1.msra.mxu1 %v85_v3  ;;  %v553_v3 = vld [vmem:[#allocation2 + $0x348] sm:$0xff] }
  0x3e   :  { %234 = vmatmul.mubr.f32.vlgmr.msra.gmra.mxu0 %v1627_v33  ;;  %311 = vmatmul.mubr.f32.vlgmr.msra.gmra.mxu1 %v1627_v33 }
  0x3f   :  { %239 = vmatprep.mubr.f32.mxu0 %v1580_v0  ;;  %316 = vmatprep.mubr.f32.mxu1 %v1580_v0 }
  0x42   :  { %240 = vmatmul.mubr.f32.gmra.mxu0 %v1634_v34  ;;  %317 = vmatmul.mubr.f32.gmra.mxu1 %v1634_v34 }
  0xfe   :  { %v235_v9 = vpop.f32.mrf.mxu0  ;;  %v312_v28 = vpop.f32.mrf.mxu1 }
  0xff   :  { %v236_v10 = vadd.f32 %v235_v9, %v152_v8  ;;  %v313_v32 = vadd.f32 %v312_v28, %v160_v29  ;;  %v552_v9 = vld [vmem:[#allocation2 + $0x340] sm:$0xff]  ;;  %v539_v28 = vld [vmem:[#allocation2 + $0x2d8] sm:$0xff] }
 0x100   :  { %v237_v12 = vpop.f32.mrf.mxu0  ;;  %v1679_v30 = vpop.f32.mrf.mxu1 }
 0x101   :  { %1395 = vmatprep.mubr.f32.mxu0 %v236_v10  ;;  %v238_v17 = vadd.f32 %v237_v12, %v156_v14  ;;  %v554_v10 = vld [vmem:[#allocation2 + $0x350] sm:$0xff]  ;;  %v549_v12 = vld [vmem:[#allocation2 + $0x328] sm:$0xff] }
 0x102   :  { %v241_v13 = vpop.f32.mrf.mxu0  ;;  %v318_v31 = vpop.f32.mrf.mxu1 }
 0x103   :  { %v242_v18 = vadd.f32 %v241_v13, %v152_v8  ;;  %v319_v33 = vadd.f32 %v318_v31, %v160_v29  ;;  %v555_v8 = vld [vmem:[#allocation2 + $0x358] sm:$0xff]  ;;  %v536_v29 = vld [vmem:[#allocation2 + $0x2c0] sm:$0xff]  ;;  %v538_v31 = vld [vmem:[#allocation2 + $0x2d0] sm:$0xff] }
 0x104   :  { %v243_v15 = vpop.f32.mrf.mxu0  ;;  %v551_v13 = vld [vmem:[#allocation2 + $0x338] sm:$0xff] }
 0x105   :  { %v244_v16 = vadd.f32 %v243_v15, %v156_v14  ;;  %1398 = vmatprep.subr.mxu1 %v319_v33  ;;  %v548_v14 = vld [vmem:[#allocation2 + $0x320] sm:$0xff]  ;;  %v550_v15 = vld [vmem:[#allocation2 + $0x330] sm:$0xff] }
 0x106   :  { %1399 = vmatpush3.msra.mxu1 %v319_v33  ;;  %v535_v33 = vld [vmem:[#allocation2 + $0x2b8] sm:$0xff] }
 0x107   :  { %1391 = vmatprep.subr.mxu0 %v244_v16  ;;  %1400 = vmatprep.subr.mxu1 %v313_v32 }
 0x108   :  { %1392 = vmatpush3.xpose.msra.mxu0 %v244_v16  ;;  %1401 = vmatpush3.msra.mxu1 %v313_v32  ;;  %v545_v16 = vld [vmem:[#allocation2 + $0x308] sm:$0xff] }
 0x109   :  { %1393 = vmatprep.subr.mxu0 %v238_v17  ;;  %676 = vmatprep.subr.mxu1 %v575_v47  ;;  %v533_v32 = vld [vmem:[#allocation2 + $0x2a8] sm:$0xff]  ;;  %v522_v47 = vld [vmem:[#allocation2 + $0x250] sm:$0xff] }
 0x10c   :  { %1394 = vmatpush3.xpose.msra.mxu0 %v238_v17  ;;  %v547_v17 = vld [vmem:[#allocation2 + $0x318] sm:$0xff] }
 0x10d   :  { %599 = vmatprep.subr.mxu0 %v573_v46  ;;  %v520_v46 = vld [vmem:[#allocation2 + $0x240] sm:$0xff] }
 0x10f   :  { %1396 = vmatmul.mubr.f32.vlgmr.msra.gmra.mxu0 %v242_v18  ;;  %v544_v18 = vld [vmem:[#allocation2 + $0x300] sm:$0xff] }
 0x110   :  { %663 = vmatprep.mubr.f32.mxu0 %v1580_v0  ;;  %600 = vmatpush1.msra.mxu0 %v572_v48  ;;  %v517_v48 = vld [vmem:[#allocation2 + $0x228] sm:$0xff] }
 0x111   :  { %601 = vmatprep.subr.mxu0 %v569_v50  ;;  %v516_v50 = vld [vmem:[#allocation2 + $0x220] sm:$0xff] }
 0x112   :  { %602 = vmatpush1.msra.mxu0 %v568_v52  ;;  %v513_v52 = vld [vmem:[#allocation2 + $0x208] sm:$0xff] }
 0x113   :  { %603 = vmatprep.subr.mxu0 %v565_v54  ;;  %v512_v54 = vld [vmem:[#allocation2 + $0x200] sm:$0xff] }
 0x114   :  { %604 = vmatpush1.msra.mxu0 %v564_v56 }
 0x115   :  { %605 = vmatprep.subr.mxu0 %v561_v58 }
 0x116   :  { %606 = vmatpush1.msra.mxu0 %v560_v60  ;;  %v163_v60 = vsub.s32 3, %v1641_v5 }
 0x117   :  { %607 = vmatprep.subr.mxu0 %v557_v62 }
 0x118   :  { %608 = vmatpush1.msra.mxu0 %v556_v1  ;;  %v164_v62 = vrot.slane %v1647_v7, %v163_v60  ;;  %v1700_v7 = vld [vmem:[%s1776_s3 + $0x4] sm:$0xf] }
 0x119   :  { %609 = vmatprep.subr.mxu0 %v553_v3 }
 0x11a   :  { %610 = vmatpush1.msra.mxu0 %v552_v9  ;;  %v315_v3 = vadd.f32 %v1679_v30, %v164_v62  ;;  %v582_v30 = vrot.slane %v1700_v7, %v151_v6 }
 0x11b   :  { %611 = vmatprep.subr.mxu0 %v549_v12 }
 0x11c   :  { %612 = vmatpush1.msra.mxu0 %v548_v14 }
 0x11d   :  { %613 = vmatprep.subr.mxu0 %v545_v16 }
 0x11e   :  { %614 = vmatpush1.msra.mxu0 %v544_v18 }
 0x1cf   :  { %v1397_v21 = vpop.f32.mrf.mxu0 }
 0x1d0   :  { %v399_v25 = vsel %vm54_vm1, %v1397_v21, -1e+30  ;;  %v546_v21 = vld [vmem:[#allocation2 + $0x310] sm:$0xff] }
 0x1d1   :  { %v389_v22 = vpop.f32.mrf.mxu0  ;;  %v403_v26 = vsel %vm68_vm2, %v399_v25, -inf }
 0x1d2   :  { %v398_v23 = vsel %vm53_vm0, %v389_v22, -1e+30  ;;  %v541_v22 = vld [vmem:[#allocation2 + $0x2e8] sm:$0xff] }
 0x1d3   :  { %v400_v24 = vsel %vm68_vm2, %v398_v23, -inf  ;;  %615 = vmatprep.subr.mxu0 %v541_v22  ;;  %v590_v22 = vrot.slane %v1700_v7, %v159_v27 }
 0x1d4   :  { %401 = vmax.xlane.f32.xlu0 %v400_v24  ;;  %v540_v24 = vld [vmem:[#allocation2 + $0x2e0] sm:$0xff] }
 0x1d5   :  { %616 = vmatpush1.msra.mxu0 %v540_v24 }
 0x1d8   :  { %404 = vmax.xlane.f32.xlu0 %v403_v26  ;;  %v537_v26 = vld [vmem:[#allocation2 + $0x2c8] sm:$0xff] }
 0x1d9   :  { %617 = vmatprep.subr.mxu0 %v537_v26 }
 0x1da   :  { %618 = vmatpush1.msra.mxu0 %v536_v29 }
 0x1db   :  { %619 = vmatprep.subr.mxu0 %v533_v32 }
 0x25d   :  { %v402_v34 = vpop.xlane.xlu0 %401 }
 0x25e   :  { %v406_v35 = vsub.f32 %v398_v23, %v402_v34  ;;  %v543_v23 = vld [vmem:[#allocation2 + $0x2f8] sm:$0xff]  ;;  %v532_v34 = vld [vmem:[#allocation2 + $0x2a0] sm:$0xff] }
 0x25f   :  { %620 = vmatpush1.msra.mxu0 %v532_v34 }
 0x260   :  { %v408_v36 = vmul.f32 1.442695, %v406_v35  ;;  %v534_v35 = vld [vmem:[#allocation2 + $0x2b0] sm:$0xff] }
 0x261   :  { %v405_v37 = vpop.xlane.xlu0 %404 }
 0x262   :  { %1510 = vpow2.f32 %v408_v36  ;;  %v407_v38 = vsub.f32 %v399_v25, %v405_v37  ;;  %v542_v25 = vld [vmem:[#allocation2 + $0x2f0] sm:$0xff]  ;;  %v529_v36 = vld [vmem:[#allocation2 + $0x288] sm:$0xff]  ;;  %v531_v37 = vld [vmem:[#allocation2 + $0x298] sm:$0xff] }
 0x263   :  { %621 = vmatprep.subr.mxu0 %v529_v36 }
 0x264   :  { %v410_v39 = vmul.f32 1.442695, %v407_v38  ;;  %v528_v38 = vld [vmem:[#allocation2 + $0x280] sm:$0xff] }
 0x265   :  { %622 = vmatpush1.msra.mxu0 %v528_v38 }
 0x266   :  { %1512 = vpow2.f32 %v410_v39  ;;  %v530_v39 = vld [vmem:[#allocation2 + $0x290] sm:$0xff] }
 0x26f   :  { %v1511_v40 = vpop.eup %1510 }
 0x270   :  { %v412_v41 = vsel %vm53_vm0, %v1511_v40, 0.0  ;;  %v525_v40 = vld [vmem:[#allocation2 + $0x268] sm:$0xff] }
 0x271   :  { %1402 = vmatprep.mubr.msk.f32.mxu1 %vm68_vm2, %v412_v41  ;;  %v414_v42 = vsel %vm68_vm2, %v412_v41, 0.0  ;;  %v527_v41 = vld [vmem:[#allocation2 + $0x278] sm:$0xff]  ;;  %623 = vmatprep.subr.mxu0 %v525_v40 }
 0x272   :  { %415 = vadd.xlane.f32.xlu1 %v414_v42  ;;  %v524_v42 = vld [vmem:[#allocation2 + $0x260] sm:$0xff] }
 0x273   :  { %v1513_v43 = vpop.eup %1512  ;;  %624 = vmatpush1.msra.mxu0 %v524_v42 }
 0x274   :  { %v413_v44 = vsel %vm54_vm1, %v1513_v43, 0.0  ;;  %v526_v43 = vld [vmem:[#allocation2 + $0x270] sm:$0xff] }
 0x275   :  { %1403 = vmatmul.mubr.msk.f32.vlgmr.msra.gmra.mxu1 %vm68_vm2, %v413_v44  ;;  %v417_v45 = vsel %vm68_vm2, %v413_v44, 0.0  ;;  %v521_v44 = vld [vmem:[#allocation2 + $0x248] sm:$0xff] }
 0x276   :  { %418 = vadd.xlane.f32.xlu1 %v417_v45  ;;  %740 = vmatprep.mubr.f32.mxu1 %v1580_v0  ;;  %v523_v45 = vld [vmem:[#allocation2 + $0x258] sm:$0xff] }
 0x277   :  { %677 = vmatpush1.msra.mxu1 %v574_v49  ;;  %625 = vmatprep.subr.mxu0 %v521_v44  ;;  %v519_v49 = vld [vmem:[#allocation2 + $0x238] sm:$0xff] }
 0x278   :  { %678 = vmatprep.subr.mxu1 %v571_v51  ;;  %626 = vmatpush1.msra.mxu0 %v520_v46  ;;  %v518_v51 = vld [vmem:[#allocation2 + $0x230] sm:$0xff] }
 0x279   :  { %679 = vmatpush1.msra.mxu1 %v570_v53  ;;  %627 = vmatprep.subr.mxu0 %v517_v48  ;;  %v515_v53 = vld [vmem:[#allocation2 + $0x218] sm:$0xff] }
 0x27a   :  { %680 = vmatprep.subr.mxu1 %v567_v55  ;;  %628 = vmatpush1.msra.mxu0 %v516_v50  ;;  %v514_v55 = vld [vmem:[#allocation2 + $0x210] sm:$0xff] }
 0x27b   :  { %681 = vmatpush1.msra.mxu1 %v566_v57  ;;  %629 = vmatprep.subr.mxu0 %v513_v52  ;;  %v955_v50 = vld [vmem:[#allocation4 + $0x70] sm:$0xff]  ;;  %v953_v52 = vld [vmem:[#allocation4 + $0x60] sm:$0xff] }
 0x27c   :  { %682 = vmatprep.subr.mxu1 %v563_v59  ;;  %630 = vmatpush1.msra.mxu0 %v512_v54  ;;  %v951_v54 = vld [vmem:[#allocation4 + $0x50] sm:$0xff] }
 0x27d   :  { %683 = vmatpush1.msra.mxu1 %v562_v61  ;;  %v320_v61 = vpop.f32.mrf.mxu1 }
 0x27e   :  { %684 = vmatprep.subr.mxu1 %v559_v63 }
 0x27f   :  { %685 = vmatpush1.msra.mxu1 %v558_v2 }
 0x280   :  { %686 = vmatprep.subr.mxu1 %v555_v8 }
 0x281   :  { %687 = vmatpush1.msra.mxu1 %v554_v10 }
 0x282   :  { %688 = vmatprep.subr.mxu1 %v551_v13  ;;  %v321_v13 = vadd.f32 %v320_v61, %v164_v62  ;;  %v945_v61 = vld [vmem:[#allocation4 + $0x20] sm:$0xff]  ;;  %v944_v62 = vld [vmem:[#allocation4 + $0x18] sm:$0xff] }
 0x283   :  { %689 = vmatpush1.msra.mxu1 %v550_v15 }
 0x284   :  { %690 = vmatprep.subr.mxu1 %v547_v17 }
 0x285   :  { %691 = vmatpush1.msra.mxu1 %v546_v21 }
 0x286   :  { %692 = vmatprep.subr.mxu1 %v543_v23 }
 0x287   :  { %693 = vmatpush1.msra.mxu1 %v542_v25  ;;  %v586_v25 = vrot.slane %v1700_v7, %v155_v11 }
 0x288   :  { %694 = vmatprep.subr.mxu1 %v539_v28 }
 0x289   :  { %695 = vmatpush1.msra.mxu1 %v538_v31 }
 0x28a   :  { %696 = vmatprep.subr.mxu1 %v535_v33 }
 0x28b   :  { %697 = vmatpush1.msra.mxu1 %v534_v35 }
 0x28c   :  { %698 = vmatprep.subr.mxu1 %v531_v37 }
 0x28d   :  { %699 = vmatpush1.msra.mxu1 %v530_v39 }
 0x28e   :  { %700 = vmatprep.subr.mxu1 %v527_v41 }
 0x28f   :  { %701 = vmatpush1.msra.mxu1 %v526_v43 }
 0x290   :  { %702 = vmatprep.subr.mxu1 %v523_v45 }
 0x291   :  { %703 = vmatpush1.msra.mxu1 %v522_v47 }
 0x292   :  { %704 = vmatprep.subr.mxu1 %v519_v49  ;;  %v956_v49 = vld [vmem:[#allocation4 + $0x78] sm:$0xff] }
 0x293   :  { %705 = vmatpush1.msra.mxu1 %v518_v51  ;;  %v954_v51 = vld [vmem:[#allocation4 + $0x68] sm:$0xff] }
 0x294   :  { %706 = vmatprep.subr.mxu1 %v515_v53  ;;  %v952_v53 = vld [vmem:[#allocation4 + $0x58] sm:$0xff] }
 0x295   :  { %707 = vmatpush1.msra.mxu1 %v514_v55  ;;  %v950_v55 = vld [vmem:[#allocation4 + $0x48] sm:$0xff] }
 0x2fb   :  { %v416_v56 = vpop.xlane.xlu1 %415 }
 0x2fc   :  { %vm420_vm3 = vcmp.gt.f32.partialorder %v416_v56, 0.0 }
 0x2fd   :  { %v422_v58 = vsel %vm420_vm3, %v416_v56, 1.0  ;;  %v949_v56 = vld [vmem:[#allocation4 + $0x40] sm:$0xff] }
 0x2fe   :  { %1514 = vrcp.f32 %v422_v58  ;;  %v947_v58 = vld [vmem:[#allocation4 + $0x30] sm:$0xff] }
 0x2ff   :  { %v419_v57 = vpop.xlane.xlu1 %418 }
 0x300   :  { %vm421_vm4 = vcmp.gt.f32.partialorder %v419_v57, 0.0 }
 0x301   :  { %v423_v59 = vsel %vm421_vm4, %v419_v57, 1.0  ;;  %v948_v57 = vld [vmem:[#allocation4 + $0x38] sm:$0xff] }
 0x302   :  { %1516 = vrcp.f32 %v423_v59  ;;  %v946_v59 = vld [vmem:[#allocation4 + $0x28] sm:$0xff] }
 0x30b   :  { %v1515_v1 = vpop.eup %1514 }
 0x30f   :  { %v1517_v9 = vpop.eup %1516 }
 0x335   :  { %v1404_v63 = vpop.f32.mrf.mxu1 }
 0x336   :  { %v508_v10 = vmul.f32 %v1517_v9, %v1404_v63  ;;  %v943_v63 = vld [vmem:[#allocation4 + $0x10] sm:$0xff] }
 0x337   :  { %v498_v2 = vpop.f32.mrf.mxu1 }
 0x338   :  { %v507_v8 = vmul.f32 %v1515_v1, %v498_v2  ;;  %v510_v14 = vadd.f32 %v508_v10, %v321_v13  ;;  %v942_v1 = vld [vmem:[#allocation4 + $0x8] sm:$0xff]  ;;  %v941_v2 = vld [vmem:[#allocation4] sm:$0xff] }
 0x33a   :  { %v509_v12 = vadd.f32 %v507_v8, %v315_v3  ;;  %v57_v3 = vadd.s32 8, %v1641_v5  ;;  %v59_v8 = vand.u32 127, %v55_v4 }
 0x33c   :  { %664 = vmatmul.mubr.f32.vlgmr.msra.gmra.mxu0 %v509_v12  ;;  %741 = vmatmul.mubr.f32.vlgmr.msra.gmra.mxu1 %v509_v12  ;;  %vm61_vm5 = vcmp.eq.s32.totalorder %v57_v3, %v59_v8  ;;  %vm60_vm6 = vcmp.eq.s32.totalorder %v1641_v5, %v59_v8  ;;  %v1330_v3 = vld [vmem:[%s1778_s5 + $0x1] ss:$0 sm:$0xff] }
 0x33d   :  { %669 = vmatprep.mubr.f32.mxu0 %v1580_v0  ;;  %746 = vmatprep.mubr.f32.mxu1 %v1580_v0  ;;  %v1318_v9 = vsel %vm61_vm5, 1.0, %v1580_v0  ;;  %v1317_v10 = vsel %vm60_vm6, 1.0, %v1580_v0 }
 0x33e   :  { %v1733_v12 = vadd.f32 %v1318_v9, %v1665_v20  ;;  %v66_v13 = vadd.f32 %v1317_v10, %v1660_v19  ;;  %v594_v19 = vrot.slane %v1700_v7, %v163_v60 }
 0x340   :  { %670 = vmatmul.mubr.f32.gmra.mxu0 %v510_v14  ;;  %747 = vmatmul.mubr.f32.gmra.mxu1 %v510_v14  ;;  %v72_v14 = vsel %vm68_vm2, %v1733_v12, 0.0 }
 0x3fc   :  { %v665_v15 = vpop.f32.mrf.mxu0  ;;  %v742_v16 = vpop.f32.mrf.mxu1 }
 0x3fd   :  { %v666_v17 = vadd.f32 %v665_v15, %v582_v30  ;;  %v743_v6 = vadd.f32 %v742_v16, %v590_v22 }
 0x3fe   :  { %v667_v18 = vpop.f32.mrf.mxu0  ;;  %v1705_v21 = vpop.f32.mrf.mxu1 }
 0x3ff   :  { %1409 = vmatprep.mubr.f32.mxu0 %v666_v17  ;;  %v668_v31 = vadd.f32 %v667_v18, %v586_v25 }
 0x400   :  { %v671_v23 = vpop.f32.mrf.mxu0  ;;  %v748_v24 = vpop.f32.mrf.mxu1 }
 0x401   :  { %v749_v26 = vadd.f32 %v748_v24, %v590_v22  ;;  %v672_v27 = vadd.f32 %v671_v23, %v582_v30  ;;  %v69_v30 = vsel %vm68_vm2, %v66_v13, 0.0 }
 0x402   :  { %v673_v28 = vpop.f32.mrf.mxu0  ;;  %v750_v20 = vpop.f32.mrf.mxu1 }
 0x403   :  { %v674_v29 = vadd.f32 %v673_v28, %v586_v25  ;;  %1412 = vmatprep.subr.mxu1 %v749_v26  ;;  %v745_v25 = vadd.f32 %v1705_v21, %v594_v19  ;;  %v751_v28 = vadd.f32 %v750_v20, %v594_v19 }
 0x404   :  { %1413 = vmatpush3.msra.mxu1 %v749_v26 }
 0x405   :  { %1405 = vmatprep.subr.mxu0 %v674_v29  ;;  %1414 = vmatprep.subr.mxu1 %v743_v6 }
 0x406   :  { %1406 = vmatpush3.xpose.msra.mxu0 %v674_v29  ;;  %1415 = vmatpush3.msra.mxu1 %v743_v6 }
 0x407   :  { %1407 = vmatprep.subr.mxu0 %v668_v31 }
 0x40a   :  { %1408 = vmatpush3.xpose.msra.mxu0 %v668_v31 }
 0x40b   :  { %1419 = vmatprep.subr.mxu0 %v956_v49 }
 0x40d   :  { %1410 = vmatmul.mubr.f32.vlgmr.msra.gmra.mxu0 %v672_v27 }
 0x40e   :  { %1420 = vmatpush3.msra.mxu0 %v956_v49  ;;  %v1130_v49 = vld [vmem:[#allocation4 + $0x88] sm:$0xff] }
 0x40f   :  { %1421 = vmatprep.subr.mxu0 %v955_v50 }
 0x410   :  { %1422 = vmatpush3.msra.mxu0 %v955_v50  ;;  %v1129_v50 = vld [vmem:[#allocation4 + $0x80] sm:$0xff] }
 0x411   :  { %1423 = vmatprep.subr.mxu0 %v954_v51 }
 0x412   :  { %1424 = vmatpush3.msra.mxu0 %v954_v51 }
 0x413   :  { %1425 = vmatprep.subr.mxu0 %v953_v52 }
 0x414   :  { %1426 = vmatpush3.msra.mxu0 %v953_v52 }
 0x415   :  { %1427 = vmatprep.subr.mxu0 %v952_v53 }
 0x416   :  { %1428 = vmatpush3.msra.mxu0 %v952_v53  ;;  %v1326_v53 = vld [vmem:[%s1778_s5] ss:$0 sm:$0xff] }
 0x417   :  { %1429 = vmatprep.subr.mxu0 %v951_v54 }
 0x418   :  { %1430 = vmatpush3.msra.mxu0 %v951_v54 }
 0x419   :  { %1431 = vmatprep.subr.mxu0 %v950_v55 }
 0x41a   :  { %1432 = vmatpush3.msra.mxu0 %v950_v55 }
 0x41b   :  { %1433 = vmatprep.subr.mxu0 %v949_v56 }
 0x41c   :  { %1434 = vmatpush3.msra.mxu0 %v949_v56 }
 0x41d   :  { %1435 = vmatprep.subr.mxu0 %v948_v57 }
 0x41e   :  { %1436 = vmatpush3.msra.mxu0 %v948_v57 }
 0x41f   :  { %1437 = vmatprep.subr.mxu0 %v947_v58 }
 0x420   :  { %1438 = vmatpush3.msra.mxu0 %v947_v58 }
 0x421   :  { %1439 = vmatprep.subr.mxu0 %v946_v59 }
 0x422   :  { %1440 = vmatpush3.msra.mxu0 %v946_v59 }
 0x423   :  { %1441 = vmatprep.subr.mxu0 %v945_v61 }
 0x424   :  { %1442 = vmatpush3.msra.mxu0 %v945_v61 }
 0x425   :  { %1443 = vmatprep.subr.mxu0 %v944_v62 }
 0x426   :  { %1444 = vmatpush3.msra.mxu0 %v944_v62 }
 0x427   :  { %1445 = vmatprep.subr.mxu0 %v943_v63 }
 0x428   :  { %1446 = vmatpush3.msra.mxu0 %v943_v63 }
 0x429   :  { %1447 = vmatprep.subr.mxu0 %v942_v1 }
 0x42a   :  { %1448 = vmatpush3.msra.mxu0 %v942_v1 }
 0x42b   :  { %1449 = vmatprep.subr.mxu0 %v941_v2 }
 0x42c   :  { %1450 = vmatpush3.msra.mxu0 %v941_v2 }
 0x4cd   :  { %v1411_v32 = vpop.f32.mrf.mxu0 }
 0x4ce   :  { %v829_v33 = vsel %vm54_vm1, %v1411_v32, -1e+30 }
 0x4cf   :  { %v819_v11 = vpop.f32.mrf.mxu0  ;;  %v833_v34 = vsel %vm68_vm2, %v829_v33, -inf }
 0x4d0   :  { %v828_v35 = vsel %vm53_vm0, %v819_v11, -1e+30  ;;  %834 = vmax.xlane.f32.xlu1 %v833_v34 }
 0x4d1   :  { %v830_v36 = vsel %vm68_vm2, %v828_v35, -inf }
 0x4d2   :  { %831 = vmax.xlane.f32.xlu0 %v830_v36  ;;  %v1143_v36 = vld [vmem:[#allocation4 + $0xf0] sm:$0xff] }
 0x559   :  { %v835_v37 = vpop.xlane.xlu1 %834 }
 0x55a   :  { %v837_v38 = vsub.f32 %v829_v33, %v835_v37  ;;  %v1142_v37 = vld [vmem:[#allocation4 + $0xe8] sm:$0xff] }
 0x55b   :  { %v832_v39 = vpop.xlane.xlu0 %831 }
 0x55c   :  { %v840_v40 = vmul.f32 1.442695, %v837_v38  ;;  %v836_v41 = vsub.f32 %v828_v35, %v832_v39  ;;  %v1144_v35 = vld [vmem:[#allocation4 + $0xf8] sm:$0xff]  ;;  %v1141_v38 = vld [vmem:[#allocation4 + $0xe0] sm:$0xff] }
 0x55d   :  { %v1140_v39 = vld [vmem:[#allocation4 + $0xd8] sm:$0xff] }
 0x55e   :  { %1518 = vpow2.f32 %v840_v40  ;;  %v838_v42 = vmul.f32 1.442695, %v836_v41  ;;  %v1139_v40 = vld [vmem:[#allocation4 + $0xd0] sm:$0xff]  ;;  %v1138_v41 = vld [vmem:[#allocation4 + $0xc8] sm:$0xff] }
 0x560   :  { %1520 = vpow2.f32 %v838_v42  ;;  %v1137_v42 = vld [vmem:[#allocation4 + $0xc0] sm:$0xff] }
 0x56b   :  { %v1519_v43 = vpop.eup %1518 }
 0x56c   :  { %v843_v44 = vsel %vm54_vm1, %v1519_v43, 0.0  ;;  %v1136_v43 = vld [vmem:[#allocation4 + $0xb8] sm:$0xff] }
 0x56d   :  { %v1521_v45 = vpop.eup %1520  ;;  %v847_v46 = vsel %vm68_vm2, %v843_v44, 0.0 }
 0x56e   :  { %848 = vadd.xlane.f32.xlu1 %v847_v46  ;;  %v842_v47 = vsel %vm53_vm0, %v1521_v45, 0.0  ;;  %v1134_v45 = vld [vmem:[#allocation4 + $0xa8] sm:$0xff]  ;;  %v1133_v46 = vld [vmem:[#allocation4 + $0xa0] sm:$0xff] }
 0x56f   :  { %1416 = vmatprep.mubr.msk.f32.mxu1 %vm68_vm2, %v842_v47  ;;  %v844_v48 = vsel %vm68_vm2, %v842_v47, 0.0  ;;  %v1132_v47 = vld [vmem:[#allocation4 + $0x98] sm:$0xff] }
 0x570   :  { %1417 = vmatmul.mubr.msk.f32.vlgmr.msra.gmra.mxu1 %vm68_vm2, %v843_v44  ;;  %845 = vadd.xlane.f32.xlu0 %v844_v48  ;;  %v1135_v44 = vld [vmem:[#allocation4 + $0xb0] sm:$0xff] }
 0x571   :  { %1458 = vmatprep.mubr.msk.f32.mxu1 %vm68_vm2, %v66_v13  ;;  %v1131_v48 = vld [vmem:[#allocation4 + $0x90] sm:$0xff] }
 0x572   :  { %70 = vadd.xlane.f32.xlu1 %v69_v30 }
 0x574   :  { %73 = vadd.xlane.f32.xlu0 %v72_v14 }
 0x5f7   :  { %v849_v4 = vpop.xlane.xlu1 %848 }
 0x5f8   :  { %vm851_vm7 = vcmp.gt.f32.partialorder %v849_v4, 0.0 }
 0x5f9   :  { %v846_v15 = vpop.xlane.xlu0 %845  ;;  %v853_v16 = vsel %vm851_vm7, %v849_v4, 1.0 }
 0x5fa   :  { %vm850_vm8 = vcmp.gt.f32.partialorder %v846_v15, 0.0  ;;  %1522 = vrcp.f32 %v853_v16 }
 0x5fb   :  { %v852_v0 = vsel %vm850_vm8, %v846_v15, 1.0  ;;  %v71_v27 = vpop.xlane.xlu1 %70 }
 0x5fc   :  { %1524 = vrcp.f32 %v852_v0  ;;  %vm75_vm10 = vcmp.gt.f32.partialorder %v71_v27, 0.0 }
 0x5fd   :  { %v74_v31 = vpop.xlane.xlu0 %73 }
 0x5fe   :  { %1526 = vrsqrt.f32 %v74_v31  ;;  %vm76_vm9 = vcmp.gt.f32.partialorder %v74_v31, 0.0 }
 0x5ff   :  { %1528 = vrsqrt.f32 %v71_v27 }
 0x607   :  { %v1523_v18 = vpop.eup %1522 }
 0x609   :  { %v1525_v22 = vpop.eup %1524 }
 0x60b   :  { %v1527_v5 = vpop.eup %1526 }
 0x60c   :  { %v1529_v60 = vpop.eup %1528  ;;  %v1745_v7 = vsel %vm76_vm9, %v1527_v5, 0.0 }
 0x60d   :  { %v1748_v33 = vsel %vm75_vm10, %v1529_v60, 0.0 }
 0x630   :  { %v1418_v17 = vpop.f32.mrf.mxu1 }
 0x631   :  { %v938_v23 = vmul.f32 %v1523_v18, %v1418_v17 }
 0x632   :  { %v928_v24 = vpop.f32.mrf.mxu1 }
 0x633   :  { %v937_v26 = vmul.f32 %v1525_v22, %v928_v24  ;;  %v940_v29 = vadd.f32 %v938_v23, %v751_v28 }
 0x635   :  { %v939_v6 = vadd.f32 %v937_v26, %v745_v25 }
 0x637   :  { %1451 = vmatprep.mubr.f32.mxu0 %v939_v6 }
 0x638   :  { %1452 = vmatmul.mubr.f32.vlgmr.msra.gmra.mxu0 %v940_v29 }
 0x639   :  { %1500 = vmatprep.mubr.msk.f32.mxu0 %vm68_vm2, %v66_v13 }
 0x6f8   :  { %v1453_v32 = vpop.f32.mrf.mxu0 }
 0x6f9   :  { %v1033_v21 = vmul.f32 %v1453_v32, %v1745_v7 }
 0x6fa   :  { %v1023_v11 = vpop.f32.mrf.mxu0 }
 0x6fb   :  { %v1032_v34 = vmul.f32 %v1023_v11, %v1748_v33  ;;  %1454 = vmatprep.subr.mxu1 %v1033_v21 }
 0x6fc   :  { %1455 = vmatpush3.msra.mxu1 %v1033_v21 }
 0x6fd   :  { %1456 = vmatprep.subr.mxu1 %v1032_v34 }
 0x6fe   :  { %1457 = vmatpush3.msra.mxu1 %v1032_v34 }
 0x6ff   :  { %1459 = vmatmul.mubr.msk.f32.vlgmr.msra.gmra.mxu1 %vm68_vm2, %v1733_v12  ;;  %1461 = vmatprep.subr.mxu1 %v1144_v35 }
 0x700   :  { %1462 = vmatpush3.msra.mxu1 %v1144_v35 }
 0x701   :  { %1463 = vmatprep.subr.mxu1 %v1143_v36 }
 0x702   :  { %1464 = vmatpush3.msra.mxu1 %v1143_v36 }
 0x703   :  { %1465 = vmatprep.subr.mxu1 %v1142_v37 }
 0x704   :  { %1466 = vmatpush3.msra.mxu1 %v1142_v37 }
 0x705   :  { %1467 = vmatprep.subr.mxu1 %v1141_v38 }
 0x706   :  { %1468 = vmatpush3.msra.mxu1 %v1141_v38 }
 0x707   :  { %1469 = vmatprep.subr.mxu1 %v1140_v39 }
 0x708   :  { %1470 = vmatpush3.msra.mxu1 %v1140_v39 }
 0x709   :  { %1471 = vmatprep.subr.mxu1 %v1139_v40 }
 0x70a   :  { %1472 = vmatpush3.msra.mxu1 %v1139_v40 }
 0x70b   :  { %1473 = vmatprep.subr.mxu1 %v1138_v41 }
 0x70c   :  { %1474 = vmatpush3.msra.mxu1 %v1138_v41 }
 0x70d   :  { %1475 = vmatprep.subr.mxu1 %v1137_v42 }
 0x70e   :  { %1476 = vmatpush3.msra.mxu1 %v1137_v42 }
 0x70f   :  { %1477 = vmatprep.subr.mxu1 %v1136_v43 }
 0x710   :  { %1478 = vmatpush3.msra.mxu1 %v1136_v43 }
 0x711   :  { %1479 = vmatprep.subr.mxu1 %v1135_v44 }
 0x712   :  { %1480 = vmatpush3.msra.mxu1 %v1135_v44 }
 0x713   :  { %1481 = vmatprep.subr.mxu1 %v1134_v45 }
 0x714   :  { %1482 = vmatpush3.msra.mxu1 %v1134_v45 }
 0x715   :  { %1483 = vmatprep.subr.mxu1 %v1133_v46 }
 0x716   :  { %1484 = vmatpush3.msra.mxu1 %v1133_v46 }
 0x717   :  { %1485 = vmatprep.subr.mxu1 %v1132_v47 }
 0x718   :  { %1486 = vmatpush3.msra.mxu1 %v1132_v47 }
 0x719   :  { %1487 = vmatprep.subr.mxu1 %v1131_v48 }
 0x71a   :  { %1488 = vmatpush3.msra.mxu1 %v1131_v48 }
 0x71b   :  { %1489 = vmatprep.subr.mxu1 %v1130_v49 }
 0x71c   :  { %1490 = vmatpush3.msra.mxu1 %v1130_v49 }
 0x71d   :  { %1491 = vmatprep.subr.mxu1 %v1129_v50 }
 0x71e   :  { %1492 = vmatpush3.msra.mxu1 %v1129_v50 }
 0x7bf   :  { %v1460_v51 = vpop.f32.mrf.mxu1 }
 0x7c0   :  { %v1116_v52 = vmul.f32 %v1460_v51, %v1745_v7 }
 0x7c1   :  { %v1106_v54 = vpop.f32.mrf.mxu1 }
 0x7c2   :  { %v1115_v55 = vmul.f32 %v1106_v54, %v1748_v33  ;;  %v1125_v56 = vadd.f32 %v1326_v53, %v1116_v52 }
 0x7c4   :  { %v1124_v57 = vadd.f32 %v1326_v53, %v1115_v55  ;;  %v1127_v59 = vmax.f32 %v1125_v56, 0.0 }
 0x7c6   :  { %v1126_v58 = vmax.f32 %v1124_v57, 0.0 }
 0x7c8   :  { %1493 = vmatprep.mubr.f32.mxu1 %v1126_v58 }
 0x7c9   :  { %1494 = vmatmul.mubr.f32.vlgmr.msra.gmra.mxu1 %v1127_v59 }
 0x889   :  { %v1495_v61 = vpop.f32.mrf.mxu1 }
 0x88a   :  { %v1221_v62 = vmul.f32 %v1495_v61, %v1745_v7 }
 0x88b   :  { %v1211_v63 = vpop.f32.mrf.mxu1 }
 0x88c   :  { %v1220_v1 = vmul.f32 %v1211_v63, %v1748_v33  ;;  %1496 = vmatprep.subr.mxu0 %v1221_v62 }
 0x88d   :  { %1497 = vmatpush3.msra.mxu0 %v1221_v62 }
 0x88e   :  { %1498 = vmatprep.subr.mxu0 %v1220_v1 }
 0x88f   :  { %1499 = vmatpush3.msra.mxu0 %v1220_v1 }
 0x890   :  { %1501 = vmatmul.mubr.msk.f32.vlgmr.msra.gmra.mxu0 %vm68_vm2, %v1733_v12 }
 0x950   :  { %v1502_v2 = vpop.f32.mrf.mxu0 }
 0x951   :  { %v1298_v8 = vmul.f32 %v1502_v2, %v1745_v7 }
 0x952   :  { %v1288_v9 = vpop.f32.mrf.mxu0 }
 0x953   :  { %v1308_v10 = vadd.f32 %v1330_v3, %v1298_v8  ;;  %v1297_v13 = vmul.f32 %v1288_v9, %v1748_v33 }
 0x955   :  { %1310 = vst [vmem:[%s1779_s6 + $0x8] sm:$0xff] %v1308_v10  ;;  %v1307_v14 = vadd.f32 %v1330_v3, %v1297_v13 }
 0x957   :  { %1309 = vst [vmem:[%s1779_s6] sm:$0xff] %v1307_v14 }
 0x958   :  { %1315 = vsyncpa [#allocation3], 1 }
 0x959   :  { %1316 = vsyncpa [#allocation5], 1 }

</bundles_post_ra>
